<compile_context>
chip_gen: v7x
topology: tpu7x:2x2x1
jax: 0.10.0
libtpu: 0.0.40
codegen_flags: <defaults>
</compile_context>

<pallas_src>
import functools

import jax
import jax.numpy as jnp
from jax.experimental import pallas as pl
from jax.experimental.pallas import tpu as pltpu

_SQRT2 = 1.4142135623730951
_SQRT_2_OVER_PI = 0.7978845608028654


def _round_up(x, m):
    return (x + m - 1) // m * m


def _gelu(x, approx):
    if approx:
        # tanh approximation: EUP slot, overlaps MXU work.
        return 0.5 * x * (1.0 + jnp.tanh(_SQRT_2_OVER_PI * (x + 0.044715 * x * x * x)))
    # nn.GELU() default is the exact erf formulation.
    return 0.5 * x * (1.0 + jax.lax.erf(x / _SQRT2))


def _vmem_capacity_bytes():
    """Generation-aware VMEM capacity (64 MiB conservative fallback, v7x)."""
    try:
        info = pltpu.get_tpu_info()
        for attr in ("vmem_capacity_bytes", "vmem_size_bytes", "vmem_bytes"):
            cap = getattr(info, attr, None)
            if cap:
                return int(cap)
    except Exception:
        pass
    return 64 * 1024 * 1024


def _choose_row_tile(M, max_tile):
    """Pick (row_tile, M_pad): multiples of 128 (16 for tiny M), row_tile | M_pad,
    and >= 2 grid steps when M allows (keeps both v7x cores busy)."""
    if M <= 128:
        rt = _round_up(max(M, 16), 16)
        return rt, rt
    M_pad = _round_up(M, 128)
    cap = max(128, min(_round_up(max_tile, 128), (M_pad // 2) // 128 * 128))
    rt = 128
    cand = cap
    while cand >= 128:
        if M_pad % cand == 0:
            rt = cand
            break
        cand -= 128
    return rt, M_pad


# ---------------------------------------------------------------------------
# Kernel: grid = (row_tiles [parallel], H_tiles [arbitrary])
# ---------------------------------------------------------------------------
def fc_class_kernel(x_ref, w1_ref, b1_ref, w2_ref, b2_ref, wc_ref, bc_ref,
                    logits_ref, mlp_ref, y_acc, *, approx_gelu):
    j = pl.program_id(1)
    nj = pl.num_programs(1)
    mm_dtype = w1_ref.dtype  # bf16 fast path, f32 exact-parity path

    @pl.when(j == 0)
    def _():
        y_acc[...] = jnp.zeros_like(y_acc)

    # Linear(dim -> 4*dim) on this H chunk, f32 accumulation + f32 GELU.
    h = jnp.dot(x_ref[...], w1_ref[...],
                preferred_element_type=jnp.float32) + b1_ref[...]
    h = _gelu(h, approx_gelu)
    # Dropout(p=0.1): identity in eval mode.

    # Partial Linear(4*dim -> dim): accumulate into the f32 VMEM scratch.
    y_acc[...] += jnp.dot(h.astype(mm_dtype), w2_ref[...],
                          preferred_element_type=jnp.float32)

    @pl.when(j == nj - 1)
    def _():
        y = y_acc[...] + b2_ref[...]                       # mlp_embedding (f32)
        logits = jnp.dot(y.astype(mm_dtype), wc_ref[...],
                         preferred_element_type=jnp.float32) + bc_ref[...]
        mlp_ref[...] = y.astype(mlp_ref.dtype)
        logits_ref[...] = logits.astype(logits_ref.dtype)


# ---------------------------------------------------------------------------
# Parameter preparation (do once, reuse across forward calls)
# ---------------------------------------------------------------------------
def prepare_params(params, *, matmul_dtype=jnp.bfloat16, h_tile=512):
    """Pad all matmul dims to multiples of 128 and cast to the MXU dtype once."""
    w1, b1, w2, b2, wc, bc = params
    D, H = w1.shape
    C = wc.shape[1]
    D_pad = _round_up(D, 128)
    H_pad = _round_up(H, 128)
    C_pad = _round_up(C, 128)

    ht = max(128, min(_round_up(h_tile, 128), H_pad))
    while H_pad % ht:
        ht -= 128

    w1p = jnp.pad(w1, ((0, D_pad - D), (0, H_pad - H))).astype(matmul_dtype)
    b1p = jnp.pad(b1, (0, H_pad - H)).reshape(1, H_pad).astype(jnp.float32)
    w2p = jnp.pad(w2, ((0, H_pad - H), (0, D_pad - D))).astype(matmul_dtype)
    b2p = jnp.pad(b2, (0, D_pad - D)).reshape(1, D_pad).astype(jnp.float32)
    wcp = jnp.pad(wc, ((0, D_pad - D), (0, C_pad - C))).astype(matmul_dtype)
    bcp = jnp.pad(bc, (0, C_pad - C)).reshape(1, C_pad).astype(jnp.float32)

    return dict(w1=w1p, b1=b1p, w2=w2p, b2=b2p, wc=wcp, bc=bcp,
                D=D, H=H, C=C, D_pad=D_pad, H_pad=H_pad, C_pad=C_pad,
                h_tile=ht, matmul_dtype=matmul_dtype)


# ---------------------------------------------------------------------------
# Forward wrapper
# ---------------------------------------------------------------------------
def fc_class_forward(embedding, params, *, row_tile=512, approx_gelu=True,
                     matmul_dtype=jnp.bfloat16, h_tile=512, out_dtype=None):
    """embedding: (..., D). params: raw tuple or prepare_params() dict.
    Returns (result, mlp_embedding)."""
    prepared = params if isinstance(params, dict) else prepare_params(
        params, matmul_dtype=matmul_dtype, h_tile=h_tile)
    mm_dtype = prepared["matmul_dtype"]
    D, C = prepared["D"], prepared["C"]
    D_pad, H_pad, C_pad = prepared["D_pad"], prepared["H_pad"], prepared["C_pad"]
    ht = prepared["h_tile"]

    orig_shape = embedding.shape
    assert orig_shape[-1] == D, "embedding feature dim does not match params"
    out_dtype = embedding.dtype if out_dtype is None else out_dtype

    x2d = embedding.reshape(-1, D)
    M = x2d.shape[0]
    rt, M_pad = _choose_row_tile(M, row_tile)

    # Pad rows to M_pad and features to the lane-dense D_pad; cast once.
    xk = jnp.pad(x2d, ((0, M_pad - M), (0, D_pad - D))).astype(mm_dtype)

    grid = (M_pad // rt, H_pad // ht)
    mm_bytes = jnp.dtype(mm_dtype).itemsize
    out_bytes = jnp.dtype(out_dtype).itemsize

    # Tight VMEM estimate: double-buffered input/weight-chunk/output tiles,
    # f32 accumulator scratch, f32 temporaries.  ~4 MiB slack, generation-aware cap.
    vmem_est = (
        2 * rt * D_pad * mm_bytes                  # x tile
        + 2 * (D_pad * ht + ht * D_pad) * mm_bytes  # W1/W2 chunks (streamed)
        + 2 * D_pad * C_pad * mm_bytes             # Wc (grid-invariant)
        + 2 * (ht + D_pad + C_pad) * 4             # biases (f32)
        + 2 * rt * (C_pad + D_pad) * out_bytes     # output tiles
        + rt * D_pad * 4                           # y accumulator scratch
        + 2 * rt * ht * 4                          # h temporaries
        + rt * C_pad * 4                           # logits temporary
    )
    vmem_ceiling = max(_vmem_capacity_bytes() - 8 * 1024 * 1024, 32 * 1024 * 1024)
    vmem_limit = int(min(max(vmem_est + 4 * 1024 * 1024, 32 * 1024 * 1024),
                         vmem_ceiling))

    cost = pl.CostEstimate(
        flops=2 * M_pad * (D_pad * H_pad + H_pad * D_pad + D_pad * C_pad),
        transcendentals=M_pad * H_pad,
        bytes_accessed=(M_pad * D_pad * mm_bytes
                        + (D_pad * H_pad + H_pad * D_pad + D_pad * C_pad) * mm_bytes
                        + (H_pad + D_pad + C_pad) * 4
                        + M_pad * (C_pad + D_pad) * out_bytes),
    )

    kernel = functools.partial(fc_class_kernel, approx_gelu=approx_gelu)

    logits, mlp = pl.pallas_call(
        kernel,
        out_shape=(
            jax.ShapeDtypeStruct((M_pad, C_pad), out_dtype),
            jax.ShapeDtypeStruct((M_pad, D_pad), out_dtype),
        ),
        grid_spec=pltpu.PrefetchScalarGridSpec(
            num_scalar_prefetch=0,
            grid=grid,
            in_specs=[
                pl.BlockSpec((rt, D_pad), lambda i, j: (i, 0)),      # x rows
                pl.BlockSpec((D_pad, ht), lambda i, j: (0, j)),      # W1 chunk
                pl.BlockSpec((1, ht), lambda i, j: (0, j)),          # b1 chunk
                pl.BlockSpec((ht, D_pad), lambda i, j: (j, 0)),      # W2 chunk
                pl.BlockSpec((1, D_pad), lambda i, j: (0, 0)),       # b2
                pl.BlockSpec((D_pad, C_pad), lambda i, j: (0, 0)),   # Wc
                pl.BlockSpec((1, C_pad), lambda i, j: (0, 0)),       # bc
            ],
            out_specs=[
                pl.BlockSpec((rt, C_pad), lambda i, j: (i, 0)),      # logits
                pl.BlockSpec((rt, D_pad), lambda i, j: (i, 0)),      # mlp_embedding
            ],
            scratch_shapes=[pltpu.VMEM((rt, D_pad), jnp.float32)],   # y accumulator
        ),
        compiler_params=pltpu.CompilerParams(
            dimension_semantics=("parallel", "arbitrary"),
            vmem_limit_bytes=vmem_limit,
        ),
        cost_estimate=cost,
    )(xk, prepared["w1"], prepared["b1"], prepared["w2"], prepared["b2"],
      prepared["wc"], prepared["bc"])

    result = logits[:M, :C].reshape(orig_shape[:-1] + (C,))
    mlp_embedding = mlp[:M, :D].reshape(orig_shape)
    return result, mlp_embedding


# ---------------------------------------------------------------------------
# Parameter init (nn.Linear-style, stored transposed) + pure-JAX reference
# ---------------------------------------------------------------------------
def init_params(key, input_dim, class_num):
    hidden = input_dim * 4
    ks = jax.random.split(key, 6)

    def lin(kw, kb, fan_in, fan_out):
        bound = 1.0 / jnp.sqrt(fan_in)
        w = jax.random.uniform(kw, (fan_in, fan_out), jnp.float32, -bound, bound)
        b = jax.random.uniform(kb, (fan_out,), jnp.float32, -bound, bound)
        return w, b

    w1, b1 = lin(ks[0], ks[1], input_dim, hidden)     # Linear(dim, 4*dim)
    w2, b2 = lin(ks[2], ks[3], hidden, input_dim)     # Linear(4*dim, dim)
    wc, bc = lin(ks[4], ks[5], input_dim, class_num)  # Linear(dim, class_num)
    return (w1, b1, w2, b2, wc, bc)


def _reference(x, params, mm_dtype=jnp.float32, approx_gelu=False):
    """Pure-JAX reference mirroring the kernel's dtype/GELU strategy."""
    w1, b1, w2, b2, wc, bc = params
    mm = lambda a, b: jnp.dot(a.astype(mm_dtype), b.astype(mm_dtype),
                              preferred_element_type=jnp.float32)
    h = jax.nn.gelu(mm(x, w1) + b1, approximate=approx_gelu)
    y = mm(h.astype(jnp.float32), w2) + b2
    out = mm(y, wc) + bc
    return out, y


if __name__ == "__main__":
    key = jax.random.PRNGKey(0)
    B, N, D, CLS = 2, 8, 32, 10  # batch=2, seq=8, input_dim=32, class_num=10

    k_emb, k_par = jax.random.split(key)
    embedding = jax.random.normal(k_emb, (B, N, D), jnp.float32)
    params = init_params(k_par, D, CLS)

    # Exact f32 / erf reference (matches the PyTorch module in eval mode).
    res_ref, mlp_ref = _reference(embedding, params, jnp.float32, approx_gelu=False)

    # 1) Default fast path: cached bf16 params, tanh GELU, f32 accumulation.
    prepared_bf16 = prepare_params(params, matmul_dtype=jnp.bfloat16)
    result, mlp_embedding = fc_class_forward(embedding, prepared_bf16)
    jax.block_until_ready((result, mlp_embedding))
    assert result.shape == (B, N, CLS) and mlp_embedding.shape == (B, N, D)
    res_bf, mlp_bf = _reference(embedding, params, jnp.bfloat16, approx_gelu=True)
    assert jnp.allclose(result, res_bf, atol=2e-2, rtol=2e-2)
    assert jnp.allclose(mlp_embedding, mlp_bf, atol=2e-2, rtol=2e-2)
    assert jnp.allclose(result, res_ref, atol=0.3, rtol=0.1)
    assert jnp.allclose(mlp_embedding, mlp_ref, atol=0.3, rtol=0.1)

    # 2) Exact f32 + erf path: strict parity with the PyTorch-style reference.
    prepared_f32 = prepare_params(params, matmul_dtype=jnp.float32)
    r32, m32 = fc_class_forward(embedding, prepared_f32, approx_gelu=False)
    jax.block_until_ready((r32, m32))
    assert jnp.allclose(r32, res_ref, atol=1e-4, rtol=1e-4)
    assert jnp.allclose(m32, mlp_ref, atol=1e-4, rtol=1e-4)

    # 3) Ragged row count (reuses the cached params; exercises M/D padding).
    emb_r = embedding[:, :7, :]
    rr, mr = fc_class_forward(emb_r, prepared_f32, approx_gelu=False)
    jax.block_until_ready((rr, mr))
    assert rr.shape == (B, 7, CLS) and mr.shape == (B, 7, D)
    assert jnp.allclose(rr, res_ref[:, :7, :], atol=1e-4, rtol=1e-4)
    assert jnp.allclose(mr, mlp_ref[:, :7, :], atol=1e-4, rtol=1e-4)

    # 4) Larger M: multi-step row grid + multi-step H streaming (accumulator path).
    D2, CLS2, M2 = 64, 10, 320
    k_e2, k_p2 = jax.random.split(jax.random.PRNGKey(1))
    emb2 = jax.random.normal(k_e2, (M2, D2), jnp.float32)
    params2 = init_params(k_p2, D2, CLS2)
    res2_ref, mlp2_ref = _reference(emb2, params2, jnp.float32, approx_gelu=False)
    prepared2 = prepare_params(params2, matmul_dtype=jnp.float32, h_tile=128)
    r2, m2 = fc_class_forward(emb2, prepared2, approx_gelu=False)
    jax.block_until_ready((r2, m2))
    assert r2.shape == (M2, CLS2) and m2.shape == (M2, D2)
    assert jnp.allclose(r2, res2_ref, atol=5e-4, rtol=5e-4)
    assert jnp.allclose(m2, mlp2_ref, atol=5e-4, rtol=5e-4)

    print("KERNEL_OK")
</pallas_src>

<mosaic_0001>
module attributes {stable_mosaic.version = 11 : i64} {
  func.func @fc_class_kernel(%arg0: i32, %arg1: i32, %arg2: memref<16x128xbf16, #tpu.memory_space<vmem>>, %arg3: memref<128x128xbf16, #tpu.memory_space<vmem>>, %arg4: memref<1x128xf32, #tpu.memory_space<vmem>>, %arg5: memref<128x128xbf16, #tpu.memory_space<vmem>>, %arg6: memref<1x128xf32, #tpu.memory_space<vmem>>, %arg7: memref<128x128xbf16, #tpu.memory_space<vmem>>, %arg8: memref<1x128xf32, #tpu.memory_space<vmem>>, %arg9: memref<16x128xf32, #tpu.memory_space<vmem>>, %arg10: memref<16x128xf32, #tpu.memory_space<vmem>>, %arg11: memref<16x128xf32, #tpu.memory_space<vmem>>) attributes {dimension_semantics = [#tpu.dimension_semantics<parallel>, #tpu.dimension_semantics<arbitrary>], iteration_bounds = array<i64: 1, 1>, scalar_prefetch = 0 : i64, scratch_operands = 1 : i64, tpu.core_type = #tpu.core_type<tc>, window_params = [{transform_indices = @transform_0, window_bounds = array<i64: 16, 128>}, {transform_indices = @transform_1, window_bounds = array<i64: 128, 128>}, {transform_indices = @transform_2, window_bounds = array<i64: 1, 128>}, {transform_indices = @transform_3, window_bounds = array<i64: 128, 128>}, {pipeline_mode = #tpu.pipeline_mode<synchronous>, transform_indices = @transform_4, window_bounds = array<i64: 1, 128>}, {pipeline_mode = #tpu.pipeline_mode<synchronous>, transform_indices = @transform_5, window_bounds = array<i64: 128, 128>}, {pipeline_mode = #tpu.pipeline_mode<synchronous>, transform_indices = @transform_6, window_bounds = array<i64: 1, 128>}, {transform_indices = @transform_7, window_bounds = array<i64: 16, 128>}, {transform_indices = @transform_8, window_bounds = array<i64: 16, 128>}]} {
    %c0_i32 = arith.constant 0 : i32
    %0 = arith.cmpi eq, %arg1, %c0_i32 : i32
    %1 = arith.extui %0 : i1 to i32
    %c0_i32_0 = arith.constant 0 : i32
    %2 = arith.cmpi ne, %1, %c0_i32_0 : i32
    scf.if %2 {
      %cst_19 = arith.constant 0.000000e+00 : f32
      %31 = vector.broadcast %cst_19 : f32 to vector<16x128xf32>
      %c0_20 = arith.constant 0 : index
      %c0_21 = arith.constant 0 : index
      %32 = vector.load %arg11[%c0_20, %c0_21] : memref<16x128xf32, #tpu.memory_space<vmem>>, vector<16x128xf32>
      tpu.vector_store %arg11[%c0_20, %c0_21], %31 {strides = array<i32>} : memref<16x128xf32, #tpu.memory_space<vmem>>, vector<16x128xf32>,
    } else {
    }
    %c0 = arith.constant 0 : index
    %c0_1 = arith.constant 0 : index
    %3 = vector.load %arg2[%c0, %c0_1] : memref<16x128xbf16, #tpu.memory_space<vmem>>, vector<16x128xbf16>
    %c0_2 = arith.constant 0 : index
    %c0_3 = arith.constant 0 : index
    %4 = vector.load %arg3[%c0_2, %c0_3] : memref<128x128xbf16, #tpu.memory_space<vmem>>, vector<128x128xbf16>
    %cst = arith.constant dense<0.000000e+00> : vector<16x128xf32>
    %5 = tpu.matmul %3, %4, %cst {dimension_numbers = #tpu.dot_dimension_numbers<[1], [0], [0], [1], [0, 0, 1, 1], [], []>} : vector<16x128xbf16>, vector<128x128xbf16>, vector<16x128xf32> -> vector<16x128xf32>
    %c0_4 = arith.constant 0 : index
    %c0_5 = arith.constant 0 : index
    %6 = vector.load %arg4[%c0_4, %c0_5] : memref<1x128xf32, #tpu.memory_space<vmem>>, vector<1x128xf32>
    %7 = vector.broadcast %6 : vector<1x128xf32> to vector<16x128xf32>
    %8 = arith.addf %5, %7 : vector<16x128xf32>
    %cst_6 = arith.constant 5.000000e-01 : f32
    %9 = vector.broadcast %cst_6 : f32 to vector<16x128xf32>
    %10 = arith.mulf %9, %8 : vector<16x128xf32>
    %cst_7 = arith.constant 4.471500e-02 : f32
    %11 = vector.broadcast %cst_7 : f32 to vector<16x128xf32>
    %12 = arith.mulf %11, %8 : vector<16x128xf32>
    %13 = arith.mulf %12, %8 : vector<16x128xf32>
    %14 = arith.mulf %13, %8 : vector<16x128xf32>
    %15 = arith.addf %8, %14 : vector<16x128xf32>
    %cst_8 = arith.constant 0.797884583 : f32
    %16 = vector.broadcast %cst_8 : f32 to vector<16x128xf32>
    %17 = arith.mulf %16, %15 : vector<16x128xf32>
    %18 = math.tanh %17 : vector<16x128xf32>
    %cst_9 = arith.constant 1.000000e+00 : f32
    %19 = vector.broadcast %cst_9 : f32 to vector<16x128xf32>
    %20 = arith.addf %19, %18 : vector<16x128xf32>
    %21 = arith.mulf %10, %20 : vector<16x128xf32>
    %c0_10 = arith.constant 0 : index
    %c0_11 = arith.constant 0 : index
    %22 = vector.load %arg11[%c0_10, %c0_11] : memref<16x128xf32, #tpu.memory_space<vmem>>, vector<16x128xf32>
    %23 = arith.truncf %21 : vector<16x128xf32> to vector<16x128xbf16>
    %c0_12 = arith.constant 0 : index
    %c0_13 = arith.constant 0 : index
    %24 = vector.load %arg5[%c0_12, %c0_13] : memref<128x128xbf16, #tpu.memory_space<vmem>>, vector<128x128xbf16>
    %cst_14 = arith.constant dense<0.000000e+00> : vector<16x128xf32>
    %25 = tpu.matmul %23, %24, %cst_14 {dimension_numbers = #tpu.dot_dimension_numbers<[1], [0], [0], [1], [0, 0, 1, 1], [], []>} : vector<16x128xbf16>, vector<128x128xbf16>, vector<16x128xf32> -> vector<16x128xf32>
    %26 = arith.addf %22, %25 : vector<16x128xf32>
    %c0_15 = arith.constant 0 : index
    %c0_16 = arith.constant 0 : index
    %27 = vector.load %arg11[%c0_15, %c0_16] : memref<16x128xf32, #tpu.memory_space<vmem>>, vector<16x128xf32>
    tpu.vector_store %arg11[%c0_15, %c0_16], %26 {strides = array<i32>} : memref<16x128xf32, #tpu.memory_space<vmem>>, vector<16x128xf32>,
    %c0_i32_17 = arith.constant 0 : i32
    %28 = arith.cmpi eq, %arg1, %c0_i32_17 : i32
    %29 = arith.extui %28 : i1 to i32
    %c0_i32_18 = arith.constant 0 : i32
    %30 = arith.cmpi ne, %29, %c0_i32_18 : i32
    scf.if %30 {
      %c0_19 = arith.constant 0 : index
      %c0_20 = arith.constant 0 : index
      %31 = vector.load %arg11[%c0_19, %c0_20] : memref<16x128xf32, #tpu.memory_space<vmem>>, vector<16x128xf32>
      %c0_21 = arith.constant 0 : index
      %c0_22 = arith.constant 0 : index
      %32 = vector.load %arg6[%c0_21, %c0_22] : memref<1x128xf32, #tpu.memory_space<vmem>>, vector<1x128xf32>
      %33 = vector.broadcast %32 : vector<1x128xf32> to vector<16x128xf32>
      %34 = arith.addf %31, %33 : vector<16x128xf32>
      %35 = arith.truncf %34 : vector<16x128xf32> to vector<16x128xbf16>
      %c0_23 = arith.constant 0 : index
      %c0_24 = arith.constant 0 : index
      %36 = vector.load %arg7[%c0_23, %c0_24] : memref<128x128xbf16, #tpu.memory_space<vmem>>, vector<128x128xbf16>
      %cst_25 = arith.constant dense<0.000000e+00> : vector<16x128xf32>
      %37 = tpu.matmul %35, %36, %cst_25 {dimension_numbers = #tpu.dot_dimension_numbers<[1], [0], [0], [1], [0, 0, 1, 1], [], []>} : vector<16x128xbf16>, vector<128x128xbf16>, vector<16x128xf32> -> vector<16x128xf32>
      %c0_26 = arith.constant 0 : index
      %c0_27 = arith.constant 0 : index
      %38 = vector.load %arg8[%c0_26, %c0_27] : memref<1x128xf32, #tpu.memory_space<vmem>>, vector<1x128xf32>
      %39 = vector.broadcast %38 : vector<1x128xf32> to vector<16x128xf32>
      %40 = arith.addf %37, %39 : vector<16x128xf32>
      %c0_28 = arith.constant 0 : index
      %c0_29 = arith.constant 0 : index
      %41 = vector.load %arg10[%c0_28, %c0_29] : memref<16x128xf32, #tpu.memory_space<vmem>>, vector<16x128xf32>
      tpu.vector_store %arg10[%c0_28, %c0_29], %34 {strides = array<i32>} : memref<16x128xf32, #tpu.memory_space<vmem>>, vector<16x128xf32>,
      %c0_30 = arith.constant 0 : index
      %c0_31 = arith.constant 0 : index
      %42 = vector.load %arg9[%c0_30, %c0_31] : memref<16x128xf32, #tpu.memory_space<vmem>>, vector<16x128xf32>
      tpu.vector_store %arg9[%c0_30, %c0_31], %40 {strides = array<i32>} : memref<16x128xf32, #tpu.memory_space<vmem>>, vector<16x128xf32>,
    } else {
    }
    return
  }
  func.func @transform_0(%arg0: i32, %arg1: i32) -> (i32, i32) {
    %c0_i32 = arith.constant 0 : i32
    %c0_i32_0 = arith.constant 0 : i32
    return %arg0, %c0_i32 : i32, i32
  }
  func.func @transform_1(%arg0: i32, %arg1: i32) -> (i32, i32) {
    %c0_i32 = arith.constant 0 : i32
    %c0_i32_0 = arith.constant 0 : i32
    return %c0_i32, %arg1 : i32, i32
  }
  func.func @transform_2(%arg0: i32, %arg1: i32) -> (i32, i32) {
    %c0_i32 = arith.constant 0 : i32
    %c0_i32_0 = arith.constant 0 : i32
    return %c0_i32, %arg1 : i32, i32
  }
  func.func @transform_3(%arg0: i32, %arg1: i32) -> (i32, i32) {
    %c0_i32 = arith.constant 0 : i32
    %c0_i32_0 = arith.constant 0 : i32
    return %arg1, %c0_i32 : i32, i32
  }
  func.func @transform_4(%arg0: i32, %arg1: i32) -> (i32, i32) {
    %c0_i32 = arith.constant 0 : i32
    %c0_i32_0 = arith.constant 0 : i32
    %c0_i32_1 = arith.constant 0 : i32
    return %c0_i32, %c0_i32_0 : i32, i32
  }
  func.func @transform_5(%arg0: i32, %arg1: i32) -> (i32, i32) {
    %c0_i32 = arith.constant 0 : i32
    %c0_i32_0 = arith.constant 0 : i32
    %c0_i32_1 = arith.constant 0 : i32
    return %c0_i32, %c0_i32_0 : i32, i32
  }
  func.func @transform_6(%arg0: i32, %arg1: i32) -> (i32, i32) {
    %c0_i32 = arith.constant 0 : i32
    %c0_i32_0 = arith.constant 0 : i32
    %c0_i32_1 = arith.constant 0 : i32
    return %c0_i32, %c0_i32_0 : i32, i32
  }
  func.func @transform_7(%arg0: i32, %arg1: i32) -> (i32, i32) {
    %c0_i32 = arith.constant 0 : i32
    %c0_i32_0 = arith.constant 0 : i32
    return %arg0, %c0_i32 : i32, i32
  }
  func.func @transform_8(%arg0: i32, %arg1: i32) -> (i32, i32) {
    %c0_i32 = arith.constant 0 : i32
    %c0_i32_0 = arith.constant 0 : i32
    return %arg0, %c0_i32 : i32, i32
  }
}

</mosaic_0001>

<bundles_post_ra>
// kernel: tpu_custom_call.1
= control target key start
LH: loop header
LB: loop body
LE: loop exit
PB: predicated region body
PF: predicated region fallthrough
CT: control target
= control target key end

     0   :  { %14 = vsyncpa [#allocation4], 0  ;;  %s1006_s0 = inlined_call_operand.hbm [shape: bf16[16,128], index: 0, kind: input, shape index: {}]   ;;  %s1007_s1 = inlined_call_operand.hbm [shape: bf16[128,128], index: 1, kind: input, shape index: {}]   ;;  %s1008_s2 = inlined_call_operand.vmem [shape: f32[1,128], index: 2, kind: input, shape index: {}]   ;;  %s1009_s3 = inlined_call_operand.hbm [shape: bf16[128,128], index: 3, kind: input, shape index: {}]   ;;  %s1010_s4 = inlined_call_operand.vmem [shape: f32[1,128], index: 4, kind: input, shape index: {}]   ;;  %s1011_s5 = inlined_call_operand.hbm [shape: bf16[128,128], index: 5, kind: input, shape index: {}]   ;;  %s1012_s6 = inlined_call_operand.vmem [shape: f32[1,128], index: 6, kind: input, shape index: {}]   ;;  %s1013_s7 = inlined_call_operand.hbm [shape: f32[16,128], index: 7, kind: output, shape index: {0}]   ;;  %s1014_s8 = inlined_call_operand.hbm [shape: f32[16,128], index: 8, kind: output, shape index: {1}]  }
   0x1   :  { %15 = vsyncpa [#allocation7], 0 }
   0x2   :  { %16 = vsyncpa [#allocation10], 0 }
   0x3   :  { %17 = vsyncpa [#allocation5], 0 }
   0x4   :  { %18 = vsyncpa [#allocation13], 0  ;;  %s806_s27 = smov [#allocation6]   ;;  %s807_s29 = smov [#allocation3]  }
   0x5   :  { %s36_s28 = sshll.u32 %s806_s27, 4  ;;  %s24_s30 = sshll.u32 %s807_s29, 4  ;;  %s37_s28 = int_to_ptr.vmem [resolvable:$true] %s36_s28  ;;  %s863_s30 = int_to_ptr.vmem [resolvable:$true] %s24_s30 }
   0x6   :  { %s664_s11 = scalar_lea.hbm %s1007_s1, 1024 }
   0x7   :  { %p665_p0 = scmp.ne.s32.totalorder %s1007_s1, %s664_s11  ;;  %p668_p1 = scmp.lt.u32.totalorder %s664_s11, %s1007_s1 }
   0x9   :  { %p670_p2 = pnand %p668_p1, %p665_p0 }
   0xb   :  { %673 = shalt.err (!%p670_p2)
}
   0xc   :  { %s674_s16 = scalar_lea.vmem %s37_s28, 1024  ;;  %p679_p4 = scmp.lt.s32.totalorder %s37_s28, %s37_s28 }
   0xd   :  { %p675_p3 = scmp.ne.s32.totalorder %s37_s28, %s674_s16  ;;  %p680_p5 = scmp.lt.s32.totalorder %s674_s16, %s674_s16 }
   0xf   :  { %p681_p6 = por %p680_p5, %p679_p4 }
  0x11   :  { %p682_p7 = pnand %p681_p6, %p675_p3 }
  0x13   :  { %685 = shalt.err (!%p682_p7)
}
  0x14   :  { %s808_s17 = smov 64   ;;  %s809_s18 = smov 4  }
  0x15   :  { %42 = dma.hbm_to_vmem [thread:$0]  %s1007_s1, 1024, %s37_s28, [#allocation7], %s808_s17, %s808_s17, %s809_s18  }
  0x16   :  { %s686_s23 = scalar_lea.hbm %s1006_s0, 128 }
  0x17   :  { %p687_p8 = scmp.ne.s32.totalorder %s1006_s0, %s686_s23  ;;  %p690_p9 = scmp.lt.u32.totalorder %s686_s23, %s1006_s0 }
  0x19   :  { %p692_p10 = pnand %p690_p9, %p687_p8 }
  0x1b   :  { %695 = shalt.err (!%p692_p10)
}
  0x1c   :  { %s696_s29 = scalar_lea.vmem %s863_s30, 128  ;;  %p701_p12 = scmp.lt.s32.totalorder %s863_s30, %s863_s30 }
  0x1d   :  { %p697_p11 = scmp.ne.s32.totalorder %s863_s30, %s696_s29  ;;  %p702_p13 = scmp.lt.s32.totalorder %s696_s29, %s696_s29 }
  0x1f   :  { %p703_p0 = por %p702_p13, %p701_p12 }
  0x21   :  { %p704_p1 = pnand %p703_p0, %p697_p11 }
  0x23   :  { %707 = shalt.err (!%p704_p1)
}
  0x24   :  { %30 = dma.hbm_to_vmem [thread:$0]  %s1006_s0, 128, %s863_s30, [#allocation4], %s808_s17, %s808_s17, %s809_s18  }
  0x25   :  { %s810_s9 = smov [#allocation8]   ;;  %s811_s11 = smov [#allocation9]  }
  0x26   :  { %s50_s10 = sshll.u32 %s810_s9, 4  ;;  %s64_s12 = sshll.u32 %s811_s11, 4  ;;  %s51_s10 = int_to_ptr.vmem [resolvable:$true] %s50_s10  ;;  %s900_s12 = int_to_ptr.vmem [resolvable:$true] %s64_s12 }
  0x27   :  { %s708_s15 = scalar_lea.hbm %s1009_s3, 1024 }
  0x28   :  { %p709_p2 = scmp.ne.s32.totalorder %s1009_s3, %s708_s15  ;;  %p712_p3 = scmp.lt.u32.totalorder %s708_s15, %s1009_s3 }
  0x2a   :  { %p714_p4 = pnand %p712_p3, %p709_p2 }
  0x2c   :  { %717 = shalt.err (!%p714_p4)
}
  0x2d   :  { %s718_s0 = scalar_lea.vmem %s51_s10, 1024  ;;  %p723_p6 = scmp.lt.s32.totalorder %s51_s10, %s51_s10 }
  0x2e   :  { %p719_p5 = scmp.ne.s32.totalorder %s51_s10, %s718_s0  ;;  %p724_p7 = scmp.lt.s32.totalorder %s718_s0, %s718_s0 }
  0x30   :  { %p725_p8 = por %p724_p7, %p723_p6 }
  0x32   :  { %p726_p9 = pnand %p725_p8, %p719_p5 }
  0x34   :  { %729 = shalt.err (!%p726_p9)
}
  0x35   :  { %56 = dma.hbm_to_vmem [thread:$0]  %s1009_s3, 1024, %s51_s10, [#allocation7], %s808_s17, %s808_s17, %s809_s18  }
  0x36   :  { %s730_s25 = scalar_lea.hbm %s1011_s5, 1024 }
  0x37   :  { %p731_p10 = scmp.ne.s32.totalorder %s1011_s5, %s730_s25  ;;  %p734_p11 = scmp.lt.u32.totalorder %s730_s25, %s1011_s5 }
  0x39   :  { %p736_p12 = pnand %p734_p11, %p731_p10 }
  0x3b   :  { %739 = shalt.err (!%p736_p12)
}
  0x3c   :  { %s740_s28 = scalar_lea.vmem %s900_s12, 1024  ;;  %p745_p0 = scmp.lt.s32.totalorder %s900_s12, %s900_s12 }
  0x3d   :  { %p741_p13 = scmp.ne.s32.totalorder %s900_s12, %s740_s28  ;;  %p746_p1 = scmp.lt.s32.totalorder %s740_s28, %s740_s28 }
  0x3f   :  { %p747_p2 = por %p746_p1, %p745_p0 }
  0x41   :  { %p748_p3 = pnand %p747_p2, %p741_p13 }
  0x43   :  { %751 = shalt.err (!%p748_p3)
}
  0x44   :  { %70 = dma.hbm_to_vmem [thread:$0]  %s1011_s5, 1024, %s900_s12, [#allocation10], %s808_s17, %s808_s17, %s809_s18  }
  0x45   :  { %796 = dma.done.wait [#allocation4], 128  }
  0x46   :  { %797 = vsyncadd [#allocation4], 4294967168 }
  0x47   :  { %798 = dma.done.wait [#allocation7], 2048  }
  0x48   :  { %799 = vsyncadd [#allocation7], 4294965248 }
  0x49   :  { %800 = dma.done.wait [#allocation10], 1024  }
  0x4a   :  { %801 = vsyncadd [#allocation10], 4294966272  ;;  %v812_v0 = vmov 0.0   ;;  %vm813_vm0 = vmmov 0   ;;  %v635_v1 = vld [vmem:[#allocation6] sm:$0xff]   ;;  %v636_v2 = vld [vmem:[#allocation6 + $0x8] sm:$0xff]  }
  0x4b   :  { %563 = vmatprep.subr.bf16.mxu0 %v812_v0  ;;  %579 = vmatprep.mubr.msk.bf16.mxu0 %vm813_vm0, %v812_v0  ;;  %v637_v3 = vld [vmem:[#allocation6 + $0x10] sm:$0xff]   ;;  %v638_v4 = vld [vmem:[#allocation6 + $0x18] sm:$0xff]   ;;  %v639_v5 = vld [vmem:[#allocation6 + $0x20] sm:$0xff]   ;;  %s814_s10 = smov [#allocation12]  }
  0x4c   :  { %583 = vmatprep.subr.bf16.mxu1 %v812_v0  ;;  %599 = vmatprep.mubr.msk.bf16.mxu1 %vm813_vm0, %v812_v0  ;;  %v640_v6 = vld [vmem:[#allocation6 + $0x28] sm:$0xff]   ;;  %v641_v7 = vld [vmem:[#allocation6 + $0x30] sm:$0xff]   ;;  %v642_v8 = vld [vmem:[#allocation6 + $0x38] sm:$0xff]   ;;  %s490_s11 = sshll.u32 %s814_s10, 4  ;;  %s491_s11 = int_to_ptr.vmem [resolvable:$true] %s490_s11 }
  0x4d   :  { %564 = vmatpush3.bf16.msra.mxu0 %v635_v1  ;;  %v643_v9 = vld [vmem:[#allocation3] sm:$0xff]   ;;  %v644_v10 = vld [vmem:[#allocation8] sm:$0xff]   ;;  %v645_v11 = vld [vmem:[#allocation8 + $0x8] sm:$0xff]   ;;  %s752_s12 = scalar_lea.vmem %s491_s11, 256  ;;  %p757_p5 = scmp.lt.s32.totalorder %s491_s11, %s491_s11 }
  0x4e   :  { %565 = vmatprep.subr.bf16.mxu0 %v812_v0  ;;  %584 = vmatpush3.bf16.msra.mxu1 %v644_v10  ;;  %v646_v12 = vld [vmem:[#allocation8 + $0x10] sm:$0xff]   ;;  %v647_v13 = vld [vmem:[#allocation8 + $0x18] sm:$0xff]   ;;  %v648_v14 = vld [vmem:[#allocation8 + $0x20] sm:$0xff]   ;;  %p753_p4 = scmp.ne.s32.totalorder %s491_s11, %s752_s12  ;;  %p758_p6 = scmp.lt.s32.totalorder %s752_s12, %s752_s12 }
  0x4f   :  { %585 = vmatprep.subr.bf16.mxu1 %v812_v0  ;;  %v649_v15 = vld [vmem:[#allocation8 + $0x28] sm:$0xff]   ;;  %v650_v16 = vld [vmem:[#allocation8 + $0x30] sm:$0xff]   ;;  %v651_v17 = vld [vmem:[#allocation8 + $0x38] sm:$0xff]  }
  0x50   :  { %v652_v18 = vld [vmem:[#allocation9] sm:$0xff]   ;;  %v653_v19 = vld [vmem:[#allocation9 + $0x8] sm:$0xff]   ;;  %v654_v20 = vld [vmem:[#allocation9 + $0x10] sm:$0xff]   ;;  %p759_p7 = por %p758_p6, %p757_p5 }
  0x51   :  { %566 = vmatpush3.bf16.msra.mxu0 %v636_v2  ;;  %v655_v21 = vld [vmem:[#allocation9 + $0x18] sm:$0xff]   ;;  %v656_v22 = vld [vmem:[#allocation9 + $0x20] sm:$0xff]   ;;  %v657_v23 = vld [vmem:[#allocation9 + $0x28] sm:$0xff]  }
  0x52   :  { %567 = vmatprep.subr.bf16.mxu0 %v812_v0  ;;  %586 = vmatpush3.bf16.msra.mxu1 %v645_v11  ;;  %v508_v24 = vld [vmem:[%s1008_s2] ss:$0 sm:$0xff]  ;;  %v658_v50 = vld [vmem:[#allocation9 + $0x30] sm:$0xff]   ;;  %p760_p8 = pnand %p759_p7, %p753_p4 }
  0x53   :  { %587 = vmatprep.subr.bf16.mxu1 %v812_v0  ;;  %v659_v51 = vld [vmem:[#allocation9 + $0x38] sm:$0xff]  }
  0x54   :  { %v526_v52 = vld [vmem:[%s1010_s4] ss:$0 sm:$0xff] }
  0x55   :  { %568 = vmatpush3.bf16.msra.mxu0 %v637_v3 }
  0x56   :  { %569 = vmatprep.subr.bf16.mxu0 %v812_v0  ;;  %588 = vmatpush3.bf16.msra.mxu1 %v646_v12 }
  0x57   :  { %589 = vmatprep.subr.bf16.mxu1 %v812_v0 }
  0x59   :  { %570 = vmatpush3.bf16.msra.mxu0 %v638_v4 }
  0x5a   :  { %571 = vmatprep.subr.bf16.mxu0 %v812_v0  ;;  %590 = vmatpush3.bf16.msra.mxu1 %v647_v13 }
  0x5b   :  { %591 = vmatprep.subr.bf16.mxu1 %v812_v0 }
  0x5d   :  { %572 = vmatpush3.bf16.msra.mxu0 %v639_v5 }
  0x5e   :  { %573 = vmatprep.subr.bf16.mxu0 %v812_v0  ;;  %592 = vmatpush3.bf16.msra.mxu1 %v648_v14 }
  0x5f   :  { %593 = vmatprep.subr.bf16.mxu1 %v812_v0 }
  0x61   :  { %574 = vmatpush3.bf16.msra.mxu0 %v640_v6 }
  0x62   :  { %575 = vmatprep.subr.bf16.mxu0 %v812_v0  ;;  %594 = vmatpush3.bf16.msra.mxu1 %v649_v15 }
  0x63   :  { %595 = vmatprep.subr.bf16.mxu1 %v812_v0 }
  0x65   :  { %576 = vmatpush3.bf16.msra.mxu0 %v641_v7 }
  0x66   :  { %577 = vmatprep.subr.bf16.mxu0 %v812_v0  ;;  %596 = vmatpush3.bf16.msra.mxu1 %v650_v16 }
  0x67   :  { %597 = vmatprep.subr.bf16.mxu1 %v812_v0 }
  0x69   :  { %578 = vmatpush3.bf16.msra.mxu0 %v642_v8 }
  0x6a   :  { %603 = vmatprep.subr.bf16.mxu0 %v812_v0  ;;  %598 = vmatpush3.bf16.msra.mxu1 %v651_v17 }
  0x6c   :  { %580 = vmatmul.mubr.bf16.vlgmr.msra.gmra.mrb[0].mxu0 %v643_v9 }
  0x6d   :  { %619 = vmatprep.mubr.msk.bf16.mxu0 %vm813_vm0, %v812_v0  ;;  %604 = vmatpush3.bf16.msra.mxu0 %v652_v18 }
  0x6e   :  { %605 = vmatprep.subr.bf16.mxu0 %v812_v0 }
  0x71   :  { %606 = vmatpush3.bf16.msra.mxu0 %v653_v19 }
  0x72   :  { %607 = vmatprep.subr.bf16.mxu0 %v812_v0 }
  0x75   :  { %608 = vmatpush3.bf16.msra.mxu0 %v654_v20 }
  0x76   :  { %609 = vmatprep.subr.bf16.mxu0 %v812_v0 }
  0x79   :  { %610 = vmatpush3.bf16.msra.mxu0 %v655_v21 }
  0x7a   :  { %611 = vmatprep.subr.bf16.mxu0 %v812_v0 }
  0x7d   :  { %612 = vmatpush3.bf16.msra.mxu0 %v656_v22 }
  0x7e   :  { %613 = vmatprep.subr.bf16.mxu0 %v812_v0 }
  0x81   :  { %614 = vmatpush3.bf16.msra.mxu0 %v657_v23 }
  0x82   :  { %615 = vmatprep.subr.bf16.mxu0 %v812_v0 }
  0x85   :  { %616 = vmatpush3.bf16.msra.mxu0 %v658_v50 }
  0x86   :  { %617 = vmatprep.subr.bf16.mxu0 %v812_v0 }
  0x89   :  { %618 = vmatpush3.bf16.msra.mxu0 %v659_v51 }
 0x13f   :  { %v205_v25 = vpop.f32.mrb[0].mxu0 }
 0x140   :  { %v206_v26 = vadd.f32 %v508_v24, %v205_v25  ;;  %v581_v27 = vpop.f32.mrb[1].mxu0 }
 0x141   :  { %v208_v28 = vpop.f32.mrb[2].mxu0 }
 0x142   :  { %v214_v29 = vmul.f32 0.044715, %v206_v26  ;;  %v209_v30 = vadd.f32 %v508_v24, %v208_v28  ;;  %v582_v31 = vpop.f32.mrb[3].mxu0  ;;  %v212_v44 = vmul.f32 0.5, %v206_v26 }
 0x144   :  { %v216_v32 = vmul.f32 %v214_v29, %v206_v26  ;;  %v215_v33 = vmul.f32 0.044715, %v209_v30  ;;  %v213_v45 = vmul.f32 0.5, %v209_v30 }
 0x146   :  { %v218_v34 = vmul.f32 %v216_v32, %v206_v26  ;;  %v217_v35 = vmul.f32 %v215_v33, %v209_v30 }
 0x148   :  { %v219_v36 = vmul.f32 %v217_v35, %v209_v30  ;;  %v220_v37 = vadd.f32 %v218_v34, %v206_v26 }
 0x14a   :  { %v221_v38 = vadd.f32 %v219_v36, %v209_v30  ;;  %v222_v39 = vmul.f32 0.7978846, %v220_v37 }
 0x14c   :  { %v223_v40 = vmul.f32 0.7978846, %v221_v38  ;;  %660 = vtanh.f32 %v222_v39 }
 0x14e   :  { %662 = vtanh.f32 %v223_v40 }
 0x156   :  { %v661_v41 = vpop.eup %660 }
 0x157   :  { %v226_v42 = vadd.f32 1.0, %v661_v41 }
 0x158   :  { %v663_v43 = vpop.eup %662 }
 0x159   :  { %v227_v46 = vadd.f32 1.0, %v663_v43  ;;  %v228_v47 = vmul.f32 %v226_v42, %v212_v44 }
 0x15b   :  { %v229_v48 = vmul.f32 %v227_v46, %v213_v45 }
 0x15d   :  { %v232_v49 = vpack.c.bf16 %v229_v48, %v228_v47 }
 0x15f   :  { %600 = vmatmul.mubr.bf16.vlgmr.msra.gmra.mrb[0].mxu1 %v232_v49 }
 0x232   :  { %v331_v53 = vpop.f32.mrb[0].mxu1 }
 0x233   :  { %v354_v54 = vadd.f32 %v526_v52, %v331_v53  ;;  %v601_v55 = vpop.f32.mrb[1].mxu1 }
 0x234   :  { %v334_v56 = vpop.f32.mrb[2].mxu1 }
 0x235   :  { %469 = vst [vmem:[#allocation12] sm:$0xff] %v354_v54  ;;  %v355_v57 = vadd.f32 %v526_v52, %v334_v56  ;;  %v602_v58 = vpop.f32.mrb[3].mxu1 }
 0x237   :  { %v356_v59 = vpack.c.bf16 %v355_v57, %v354_v54  ;;  %470 = vst [vmem:[#allocation12 + $0x8] sm:$0xff] %v355_v57 }
 0x239   :  { %620 = vmatmul.mubr.bf16.vlgmr.msra.gmra.mrb[4].mxu0 %v356_v59 }
 0x23a   :  { %763 = shalt.err (!%p760_p8)
}
 0x23b   :  { %s764_s14 = scalar_lea.hbm %s1014_s8, 256 }
 0x23c   :  { %p765_p9 = scmp.ne.s32.totalorder %s1014_s8, %s764_s14  ;;  %p768_p10 = scmp.lt.u32.totalorder %s764_s14, %s1014_s8 }
 0x23e   :  { %p770_p11 = pnand %p768_p10, %p765_p9 }
 0x240   :  { %773 = shalt.err (!%p770_p11)
}
 0x241   :  { %s815_s21 = smov 128   ;;  %s816_s0 = smov 8   ;;  %v527_v60 = vld [vmem:[%s1012_s6] ss:$0 sm:$0xff] }
 0x242   :  { %496 = dma.vmem_to_hbm [thread:$0]  %s491_s11, 256, %s1014_s8, [#allocation13], %s815_s21, %s815_s21, %s816_s0  }
 0x243   :  { %s817_s25 = smov [#allocation11]  }
 0x244   :  { %s478_s26 = sshll.u32 %s817_s25, 4  ;;  %s479_s26 = int_to_ptr.vmem [resolvable:$true] %s478_s26 }
 0x245   :  { %s774_s27 = scalar_lea.vmem %s479_s26, 256  ;;  %p779_p13 = scmp.lt.s32.totalorder %s479_s26, %s479_s26 }
 0x246   :  { %p775_p12 = scmp.ne.s32.totalorder %s479_s26, %s774_s27  ;;  %p780_p0 = scmp.lt.s32.totalorder %s774_s27, %s774_s27 }
 0x248   :  { %p781_p1 = por %p780_p0, %p779_p13 }
 0x24a   :  { %p782_p2 = pnand %p781_p1, %p775_p12 }
 0x30c   :  { %v462_v61 = vpop.f32.mrb[4].mxu0 }
 0x30d   :  { %v463_v62 = vadd.f32 %v527_v60, %v462_v61  ;;  %v621_v63 = vpop.f32.mrb[5].mxu0 }
 0x30e   :  { %v465_v0 = vpop.f32.mrb[6].mxu0 }
 0x30f   :  { %471 = vst [vmem:[#allocation11] sm:$0xff] %v463_v62  ;;  %v466_v1 = vadd.f32 %v527_v60, %v465_v0  ;;  %v622_v2 = vpop.f32.mrb[7].mxu0 }
 0x311   :  { %472 = vst [vmem:[#allocation11 + $0x8] sm:$0xff] %v466_v1 }
 0x312   :  { %785 = shalt.err (!%p782_p2)
}
 0x313   :  { %s786_s29 = scalar_lea.hbm %s1013_s7, 256 }
 0x314   :  { %p787_p3 = scmp.ne.s32.totalorder %s1013_s7, %s786_s29  ;;  %p790_p4 = scmp.lt.u32.totalorder %s786_s29, %s1013_s7 }
 0x316   :  { %p792_p5 = pnand %p790_p4, %p787_p3 }
 0x318   :  { %795 = shalt.err (!%p792_p5)
}
 0x319   :  { %484 = dma.vmem_to_hbm [thread:$0]  %s479_s26, 256, %s1013_s7, [#allocation5], %s815_s21, %s815_s21, %s816_s0  }
 0x31a   :  { %802 = dma.done.wait [#allocation5], 256  }
 0x31b   :  { %803 = vsyncadd [#allocation5], 4294967040 }
 0x31c   :  { %804 = dma.done.wait [#allocation13], 256  }
 0x31d   :  { %805 = vsyncadd [#allocation13], 4294967040 }
 0x31e   :  { %503 = vsyncpa [#allocation4], 1 }
 0x31f   :  { %504 = vsyncpa [#allocation7], 1 }
 0x320   :  { %505 = vsyncpa [#allocation10], 1 }
 0x321   :  { %506 = vsyncpa [#allocation5], 1 }
 0x322   :  { %507 = vsyncpa [#allocation13], 1 }

</bundles_post_ra>
